<compile_context>
chip_gen: v6e
topology: v6e:2x2x1
jax: 0.10.0
libtpu: 0.0.40
codegen_flags: <defaults>
</compile_context>

<pallas_src>
import math

import jax
import jax.numpy as jnp
from jax.experimental import pallas as pl
from jax.experimental.pallas import tpu as pltpu


def _round_up(x: int, m: int) -> int:
    return ((x + m - 1) // m) * m


def _default_row_tile() -> int:
    """Pick the row tile per TPU generation (see performance review)."""
    try:
        kind = jax.devices()[0].device_kind.lower()
    except Exception:  # pragma: no cover - defensive; default is fine anywhere
        kind = ""
    if "v7" in kind:
        # 2 TensorCores: keep several "parallel" row-grid steps to shard work.
        return 256
    # Single-TC v5e / v6e: bigger tiles, fewer ~0.35us grid-step overheads.
    return 512


# ================= tiny-K path: VPU broadcast FMA (no MXU, no K padding) =================
def _embed_small_k_kernel(x_ref, w_ref, b_ref, o_ref):
    # x_ref: [TN, K]  (K <= 8, unpadded — x stays tiny in HBM)
    # w_ref: [K, E]   (pre-transposed weight row(s))
    # b_ref: [1, E]
    # o_ref: [TN, E]  (lane-dense output)
    x = x_ref[...].astype(jnp.float32)
    w = w_ref[...].astype(jnp.float32)
    acc = jnp.broadcast_to(b_ref[...].astype(jnp.float32), o_ref.shape)
    # Static, fully unrolled tiny-K accumulation: [TN,1] * [1,E] broadcast FMAs on the VPU.
    for kk in range(x.shape[1]):
        acc = acc + x[:, kk:kk + 1] * w[kk:kk + 1, :]
    o_ref[...] = acc.astype(o_ref.dtype)


# ================= general path: MXU matmul with K tiling + f32 accumulator =================
def _embed_matmul_kernel(x_ref, w_ref, b_ref, o_ref, acc_ref):
    # x_ref: [TN, TK], w_ref: [TK, E], b_ref: [1, E], o_ref: [TN, E], acc_ref: [TN, E] f32
    @pl.when(pl.program_id(1) == 0)
    def _():
        acc_ref[...] = jnp.zeros_like(acc_ref)

    acc_ref[...] += jnp.dot(x_ref[...], w_ref[...], preferred_element_type=jnp.float32)

    @pl.when(pl.program_id(1) == pl.num_programs(1) - 1)
    def _():
        o_ref[...] = (acc_ref[...] + b_ref[...].astype(jnp.float32)).astype(o_ref.dtype)


def embedder(x, weight, bias, *, tn: int | None = None):
    """y = x @ weight.T + bias  (PyTorch nn.Linear semantics).

    x:      [..., input_dim]
    weight: [embed_dim, input_dim]
    bias:   [embed_dim]
    """
    orig_shape = x.shape
    in_dim = orig_shape[-1]
    e = weight.shape[0]
    out_dtype = x.dtype

    # Flatten all leading dims into one "rows" axis (nn.Linear broadcasts over them).
    x2 = jnp.reshape(x, (-1, in_dim))
    n = x2.shape[0]

    if tn is None:
        tn = _default_row_tile()
    tn = max(8, min(tn, _round_up(max(n, 1), 8)))
    n_pad = _round_up(max(n, 1), tn)

    b2 = jnp.reshape(bias, (1, e))

    if in_dim <= 8:
        # ---- tiny-K path (covers the real K=1 workload): no K padding, no MXU ----
        if n_pad != n:
            x2 = jnp.pad(x2, ((0, n_pad - n), (0, 0)))
        w_r = jnp.transpose(weight)  # [K, E]
        out = pl.pallas_call(
            _embed_small_k_kernel,
            out_shape=jax.ShapeDtypeStruct((n_pad, e), out_dtype),
            grid=(n_pad // tn,),
            in_specs=[
                pl.BlockSpec((tn, in_dim), lambda i: (i, 0)),  # row tile of x (unpadded K)
                pl.BlockSpec((in_dim, e), lambda i: (0, 0)),   # whole (tiny) weight, resident
                pl.BlockSpec((1, e), lambda i: (0, 0)),        # bias, resident
            ],
            out_specs=pl.BlockSpec((tn, e), lambda i: (i, 0)),
            compiler_params=pltpu.CompilerParams(
                dimension_semantics=("parallel",),             # v7x: shard rows across 2 TCs
            ),
        )(x2, w_r, b2)
    else:
        # ---- general path: MXU matmul, K tiled ("arbitrary") with an f32 VMEM accumulator ----
        tk = min(512, _round_up(in_dim, 128))
        k_pad = _round_up(in_dim, tk)
        x2 = jnp.pad(x2, ((0, n_pad - n), (0, k_pad - in_dim)))
        w_t = jnp.pad(jnp.transpose(weight), ((0, k_pad - in_dim), (0, 0)))  # [k_pad, E]
        out = pl.pallas_call(
            _embed_matmul_kernel,
            out_shape=jax.ShapeDtypeStruct((n_pad, e), out_dtype),
            grid=(n_pad // tn, k_pad // tk),
            in_specs=[
                pl.BlockSpec((tn, tk), lambda i, k: (i, k)),   # row x K tile of x
                pl.BlockSpec((tk, e), lambda i, k: (k, 0)),    # K tile of W (bounded VMEM)
                pl.BlockSpec((1, e), lambda i, k: (0, 0),
                             pipeline_mode=pl.Buffered(1)),    # constant bias: single-buffered
            ],
            out_specs=pl.BlockSpec((tn, e), lambda i, k: (i, 0)),
            scratch_shapes=[pltpu.VMEM((tn, e), jnp.float32)],
            compiler_params=pltpu.CompilerParams(
                dimension_semantics=("parallel", "arbitrary"),
            ),
        )(x2, w_t, b2)

    out = out[:n]
    return jnp.reshape(out, orig_shape[:-1] + (e,))


# ================================  main  ================================
if __name__ == "__main__":
    N, IN_DIM, EMBED_DIM = 1000, 1, 128

    key = jax.random.PRNGKey(0)
    kw, kb = jax.random.split(key)

    # Input mirrors the spec: x = linspace(0, 4*pi, 1000) with input_dim=1.
    x = jnp.linspace(0.0, 4.0 * math.pi, N, dtype=jnp.float32).reshape(N, IN_DIM)

    # nn.Linear default init: U(-1/sqrt(fan_in), 1/sqrt(fan_in)).
    bound = 1.0 / math.sqrt(IN_DIM)
    weight = jax.random.uniform(kw, (EMBED_DIM, IN_DIM), jnp.float32, -bound, bound)
    bias = jax.random.uniform(kb, (EMBED_DIM,), jnp.float32, -bound, bound)

    out = jax.block_until_ready(embedder(x, weight, bias))

    # Pure-JAX reference (exact nn.Linear semantics).
    ref = x @ weight.T + bias

    assert out.shape == (N, EMBED_DIM), out.shape
    assert bool(jnp.all(jnp.isfinite(out)))
    assert bool(jnp.allclose(out, ref, atol=1e-4, rtol=1e-4)), (
        f"max abs diff {float(jnp.max(jnp.abs(out - ref)))}"
    )
    print("KERNEL_OK")
</pallas_src>

<mosaic_0001>
module attributes {stable_mosaic.version = 11 : i64} {
  func.func @_embed_small_k_kernel(%arg0: i32, %arg1: memref<512x1xf32, #tpu.memory_space<vmem>>, %arg2: memref<1x128xf32, #tpu.memory_space<vmem>>, %arg3: memref<1x128xf32, #tpu.memory_space<vmem>>, %arg4: memref<512x128xf32, #tpu.memory_space<vmem>>) attributes {dimension_semantics = [#tpu.dimension_semantics<parallel>], iteration_bounds = array<i64: 2>, scalar_prefetch = 0 : i64, scratch_operands = 0 : i64, tpu.core_type = #tpu.core_type<tc>, window_params = [{transform_indices = @transform_0, window_bounds = array<i64: 512, 1>}, {pipeline_mode = #tpu.pipeline_mode<synchronous>, transform_indices = @transform_1, window_bounds = array<i64: 1, 128>}, {pipeline_mode = #tpu.pipeline_mode<synchronous>, transform_indices = @transform_2, window_bounds = array<i64: 1, 128>}, {transform_indices = @transform_3, window_bounds = array<i64: 512, 128>}]} {
    %c0 = arith.constant 0 : index
    %c0_0 = arith.constant 0 : index
    %0 = vector.load %arg1[%c0, %c0_0] : memref<512x1xf32, #tpu.memory_space<vmem>>, vector<512x1xf32>
    %c0_1 = arith.constant 0 : index
    %c0_2 = arith.constant 0 : index
    %1 = vector.load %arg2[%c0_1, %c0_2] : memref<1x128xf32, #tpu.memory_space<vmem>>, vector<1x128xf32>
    %c0_3 = arith.constant 0 : index
    %c0_4 = arith.constant 0 : index
    %2 = vector.load %arg3[%c0_3, %c0_4] : memref<1x128xf32, #tpu.memory_space<vmem>>, vector<1x128xf32>
    %3 = vector.shape_cast %2 : vector<1x128xf32> to vector<1x128xf32>
    %4 = vector.broadcast %3 : vector<1x128xf32> to vector<512x128xf32>
    %5 = vector.broadcast %0 : vector<512x1xf32> to vector<512x128xf32>
    %6 = vector.broadcast %1 : vector<1x128xf32> to vector<512x128xf32>
    %7 = arith.mulf %5, %6 : vector<512x128xf32>
    %8 = arith.addf %4, %7 : vector<512x128xf32>
    %c0_5 = arith.constant 0 : index
    %c0_6 = arith.constant 0 : index
    %9 = vector.load %arg4[%c0_5, %c0_6] : memref<512x128xf32, #tpu.memory_space<vmem>>, vector<512x128xf32>
    tpu.vector_store %arg4[%c0_5, %c0_6], %8 {strides = array<i32>} : memref<512x128xf32, #tpu.memory_space<vmem>>, vector<512x128xf32>,
    return
  }
  func.func @transform_0(%arg0: i32) -> (i32, i32) {
    %c0_i32 = arith.constant 0 : i32
    %c0_i32_0 = arith.constant 0 : i32
    return %arg0, %c0_i32 : i32, i32
  }
  func.func @transform_1(%arg0: i32) -> (i32, i32) {
    %c0_i32 = arith.constant 0 : i32
    %c0_i32_0 = arith.constant 0 : i32
    %c0_i32_1 = arith.constant 0 : i32
    return %c0_i32, %c0_i32_0 : i32, i32
  }
  func.func @transform_2(%arg0: i32) -> (i32, i32) {
    %c0_i32 = arith.constant 0 : i32
    %c0_i32_0 = arith.constant 0 : i32
    %c0_i32_1 = arith.constant 0 : i32
    return %c0_i32, %c0_i32_0 : i32, i32
  }
  func.func @transform_3(%arg0: i32) -> (i32, i32) {
    %c0_i32 = arith.constant 0 : i32
    %c0_i32_0 = arith.constant 0 : i32
    return %arg0, %c0_i32 : i32, i32
  }
}

</mosaic_0001>

<bundles_post_ra>
// kernel: tpu_custom_call.1
= control target key start
LH: loop header
LB: loop body
LE: loop exit
PB: predicated region body
PF: predicated region fallthrough
CT: control target
= control target key end

     0   :  { %8 = vsyncpa [#allocation3], 0  ;;  %s1359_s0 = inlined_call_operand.vmem [shape: f32[1024,1], index: 0, kind: input, shape index: {}]   ;;  %s1360_s1 = inlined_call_operand.vmem [shape: f32[1,128], index: 1, kind: input, shape index: {}]   ;;  %s1361_s2 = inlined_call_operand.vmem [shape: f32[1,128], index: 2, kind: input, shape index: {}]   ;;  %s1362_s3 = inlined_call_operand.hbm [shape: f32[1024,128], index: 3, kind: output, shape index: {}]  }
   0x1   :  { %10 = vsyncpa [#allocation3 + $0x1], 0  ;;  %s983_s12 = smov 0   ;;  %s985_s13 = smov 0  }
   0x2   :  { %s987_s14 = smov 0   ;;  %s989_s15 = smov 0  }
   0x3 LB: > { %s1004_s16 = sadd.s32 4294967295, %s957_s15   ;;  %s838_s17 = sadd.s32 4294967294, %s957_s15   ;;  %s957_s15 = sphi %s989_s15, %s1368_s15   ;;  %s953_s14 = sphi %s987_s14, %s1367_s14   ;;  %s949_s13 = sphi %s985_s13, %s1366_s13   ;;  %s945_s12 = sphi %s983_s12, %s1365_s12  }
   0x4   : > { %s1008_s18 = sadd.s32 1, %s957_s15   ;;  %s91_s19 = sadd.s32 1, %s953_s14 }
   0x5   : > { %s88_s20 = ssub.s32 %s957_s15, %s1008_s18  ;;  %p101_p0 = scmp.ne.s32.totalorder %s953_s14, %s949_s13 }
   0x6   : > { %p89_p1 = scmp.eq.s32.totalorder %s88_s20, 0  ;;  %p102_p2 = scmp.eq.s32.totalorder %s1004_s16, 1 }
   0x7   : > { %p107_p3 = scmp.ne.s32.totalorder %s949_s13, %s945_s12  ;;  %p108_p4 = scmp.eq.s32.totalorder %s838_s17, 1 }
   0x8   : > { %s1019_s21 = scalar_select %p89_p1, %s953_s14, %s91_s19  }
   0x9   : > { %p1021_p5 = por %p102_p2, %p101_p0  ;;  %p1025_p6 = por %p108_p4, %p107_p3 }
   0xa   : > { %p841_p7 = scmp.ge.s32.totalorder %s957_s15, 1  ;;  %p141_p8 = scmp.lt.s32.totalorder %s957_s15, 3 }
   0xc   : > { %p142_p9 = pnand %p841_p7, %p141_p8 }
   0xd   : > { %s843_s24 = sshll.u32 (!%p142_p9), %s1004_s16, 6  ;;  %s162_s29 = sand.u32 (!%p142_p9), 1, %s949_s13  }
   0xe   : > { %145 = sbr.rel (%p142_p9) target bundleno = 289 (0x121), region = 32  ;;  %p166_p10 = scmp.lt.s32.totalorder (!%p142_p9), %s843_s24, 127 }
   0xf   : > { %s842_s5 = sshll.u32 (!%p142_p9), %s162_s29, 9  ;;  %s852_s9 = sshll.u32 (!%p142_p9), %s1004_s16, 13 }
  0x10   : > { %s1118_s8 = scalar_lea.vmem (!%p142_p9), [#allocation2], %s842_s5  ;;  %s1309_s19 = scalar_lea.hbm (!%p142_p9), %s1362_s3, %s852_s9 }
  0x11   : > { %s776_s10 = sshll.u32 (!%p142_p9), %s1118_s8, 4  ;;  %s1319_s16 = scalar_lea.sflag (!%p142_p9), [#allocation3], %s162_s29  ;;  %s1311_s10 = int_to_ptr.vmem [resolvable:$true] %s776_s10 }
  0x12   : > { %s897_s20 = scalar_lea.vmem (!%p142_p9), %s1311_s10, 8192 }
  0x13   : > { %v959_v0 = vmov 0   ;;  %s1370_s24 = smov (!%p166_p10, %s843_s24), 127  ;;  %v1103_v63 = vld [vmem:[%s1360_s1] ss:$0 sm:$0xff]  ;;  %p898_p11 = scmp.ne.s32.totalorder %s1311_s10, %s897_s20 }
  0x14   : > { %896 = vset.pattern.permute.xlu1 %v959_v0  ;;  %895 = vset.pattern.permute.xlu0 %v959_v0  ;;  %s844_s25 = sshll.u32 %s1370_s24, 3  ;;  %s960_s24 = smov [#allocation2]  }
  0x15   : > { %s1035_s28 = scalar_lea.vmem %s1359_s0, %s844_s25  ;;  %p899_p12 = pnand %p898_p11, %p1021_p5 }
  0x16   : > { %v174_v1 = vld [vmem:[%s1035_s28 + $0x10] sm:$0xff]  ;;  %v172_v2 = vld [vmem:[%s1035_s28] sm:$0xff]  ;;  %v175_v3 = vld [vmem:[%s1035_s28 + $0x18] sm:$0xff]  ;;  %s901_s25 = sshll.u32 %s960_s24, 4  ;;  %s902_s25 = int_to_ptr.vmem [resolvable:$false] %s901_s25 }
  0x17   : > { %256 = vperm.xlu1 %896, %v174_v1   ;;  %246 = vperm.xlu0 %895, %v172_v2   ;;  %v173_v4 = vld [vmem:[%s1035_s28 + $0x8] sm:$0xff]  ;;  %v176_v6 = vld [vmem:[%s1035_s28 + $0x20] sm:$0xff]  ;;  %v179_v7 = vld [vmem:[%s1035_s28 + $0x38] sm:$0xff]  ;;  %p900_p13 = pneg %p899_p12  ;;  %s903_s26 = scalar_lea.vmem %s902_s25, 16384 }
  0x18   : > { %v177_v5 = vld [vmem:[%s1035_s28 + $0x28] sm:$0xff]  ;;  %v178_v8 = vld [vmem:[%s1035_s28 + $0x30] sm:$0xff]  ;;  %v180_v10 = vld [vmem:[%s1035_s28 + $0x40] sm:$0xff]  ;;  %p904_p0 = scmp.lt.s32.totalorder %s1311_s10, %s902_s25  ;;  %p905_p1 = scmp.lt.s32.totalorder %s903_s26, %s897_s20 }
  0x19   : > { %v181_v9 = vld [vmem:[%s1035_s28 + $0x48] sm:$0xff]  ;;  %v183_v11 = vld [vmem:[%s1035_s28 + $0x58] sm:$0xff]  ;;  %v182_v12 = vld [vmem:[%s1035_s28 + $0x50] sm:$0xff] }
  0x1a   : > { %v185_v13 = vld [vmem:[%s1035_s28 + $0x68] sm:$0xff]  ;;  %v184_v14 = vld [vmem:[%s1035_s28 + $0x60] sm:$0xff]  ;;  %v187_v15 = vld [vmem:[%s1035_s28 + $0x78] sm:$0xff]  ;;  %p906_p2 = por %p905_p1, %p904_p0 }
  0x1b   : > { %261 = vperm.xlu1 %896, %v175_v3   ;;  %251 = vperm.xlu0 %895, %v173_v4   ;;  %v186_v16 = vld [vmem:[%s1035_s28 + $0x70] sm:$0xff]  ;;  %v189_v17 = vld [vmem:[%s1035_s28 + $0x88] sm:$0xff]  ;;  %v188_v18 = vld [vmem:[%s1035_s28 + $0x80] sm:$0xff] }
  0x1c   : > { %v191_v19 = vld [vmem:[%s1035_s28 + $0x98] sm:$0xff]  ;;  %v190_v20 = vld [vmem:[%s1035_s28 + $0x90] sm:$0xff]  ;;  %v193_v21 = vld [vmem:[%s1035_s28 + $0xa8] sm:$0xff]  ;;  %p907_p3 = pnand %p906_p2, %p900_p13 }
  0x1d   : > { %v192_v22 = vld [vmem:[%s1035_s28 + $0xa0] sm:$0xff]  ;;  %v195_v23 = vld [vmem:[%s1035_s28 + $0xb8] sm:$0xff]  ;;  %v194_v24 = vld [vmem:[%s1035_s28 + $0xb0] sm:$0xff] }
  0x1e   : > { %v197_v25 = vld [vmem:[%s1035_s28 + $0xc8] sm:$0xff]  ;;  %v196_v26 = vld [vmem:[%s1035_s28 + $0xc0] sm:$0xff]  ;;  %v199_v27 = vld [vmem:[%s1035_s28 + $0xd8] sm:$0xff] }
  0x1f   : > { %271 = vperm.xlu1 %896, %v177_v5   ;;  %266 = vperm.xlu0 %895, %v176_v6   ;;  %v198_v28 = vld [vmem:[%s1035_s28 + $0xd0] sm:$0xff]  ;;  %v201_v29 = vld [vmem:[%s1035_s28 + $0xe8] sm:$0xff]  ;;  %v200_v30 = vld [vmem:[%s1035_s28 + $0xe0] sm:$0xff] }
  0x20   : > { %v203_v31 = vld [vmem:[%s1035_s28 + $0xf8] sm:$0xff]  ;;  %v202_v32 = vld [vmem:[%s1035_s28 + $0xf0] sm:$0xff]  ;;  %v205_v33 = vld [vmem:[%s1035_s28 + $0x108] sm:$0xff] }
  0x21   : > { %v204_v34 = vld [vmem:[%s1035_s28 + $0x100] sm:$0xff]  ;;  %v207_v35 = vld [vmem:[%s1035_s28 + $0x118] sm:$0xff]  ;;  %v206_v36 = vld [vmem:[%s1035_s28 + $0x110] sm:$0xff] }
  0x22   : > { %v209_v37 = vld [vmem:[%s1035_s28 + $0x128] sm:$0xff]  ;;  %v208_v38 = vld [vmem:[%s1035_s28 + $0x120] sm:$0xff]  ;;  %v211_v39 = vld [vmem:[%s1035_s28 + $0x138] sm:$0xff] }
  0x23   : > { %281 = vperm.xlu1 %896, %v179_v7   ;;  %276 = vperm.xlu0 %895, %v178_v8   ;;  %v210_v40 = vld [vmem:[%s1035_s28 + $0x130] sm:$0xff]  ;;  %v213_v41 = vld [vmem:[%s1035_s28 + $0x148] sm:$0xff]  ;;  %v212_v42 = vld [vmem:[%s1035_s28 + $0x140] sm:$0xff] }
  0x24   : > { %v215_v43 = vld [vmem:[%s1035_s28 + $0x158] sm:$0xff]  ;;  %v214_v44 = vld [vmem:[%s1035_s28 + $0x150] sm:$0xff]  ;;  %v217_v45 = vld [vmem:[%s1035_s28 + $0x168] sm:$0xff] }
  0x25   : > { %v216_v46 = vld [vmem:[%s1035_s28 + $0x160] sm:$0xff]  ;;  %v219_v47 = vld [vmem:[%s1035_s28 + $0x178] sm:$0xff]  ;;  %v218_v48 = vld [vmem:[%s1035_s28 + $0x170] sm:$0xff] }
  0x26   : > { %v221_v49 = vld [vmem:[%s1035_s28 + $0x188] sm:$0xff]  ;;  %v220_v50 = vld [vmem:[%s1035_s28 + $0x180] sm:$0xff]  ;;  %v223_v51 = vld [vmem:[%s1035_s28 + $0x198] sm:$0xff] }
  0x27   : > { %291 = vperm.xlu1 %896, %v181_v9   ;;  %286 = vperm.xlu0 %895, %v180_v10   ;;  %v222_v52 = vld [vmem:[%s1035_s28 + $0x190] sm:$0xff]  ;;  %v225_v53 = vld [vmem:[%s1035_s28 + $0x1a8] sm:$0xff]  ;;  %v224_v54 = vld [vmem:[%s1035_s28 + $0x1a0] sm:$0xff] }
  0x28   : > { %v227_v55 = vld [vmem:[%s1035_s28 + $0x1b8] sm:$0xff]  ;;  %v226_v56 = vld [vmem:[%s1035_s28 + $0x1b0] sm:$0xff]  ;;  %v229_v57 = vld [vmem:[%s1035_s28 + $0x1c8] sm:$0xff] }
  0x29   : > { %v228_v58 = vld [vmem:[%s1035_s28 + $0x1c0] sm:$0xff]  ;;  %v231_v59 = vld [vmem:[%s1035_s28 + $0x1d8] sm:$0xff]  ;;  %v230_v60 = vld [vmem:[%s1035_s28 + $0x1d0] sm:$0xff] }
  0x2a   : > { %v233_v61 = vld [vmem:[%s1035_s28 + $0x1e8] sm:$0xff]  ;;  %v232_v62 = vld [vmem:[%s1035_s28 + $0x1e0] sm:$0xff]  ;;  %v235_v0 = vld [vmem:[%s1035_s28 + $0x1f8] sm:$0xff] }
  0x2b   : > { %301 = vperm.xlu1 %896, %v183_v11   ;;  %296 = vperm.xlu0 %895, %v182_v12   ;;  %v234_v1 = vld [vmem:[%s1035_s28 + $0x1f0] sm:$0xff]  ;;  %v1112_v2 = vld [vmem:[%s1361_s2] ss:$0 sm:$0xff] }
  0x2f   : > { %311 = vperm.xlu1 %896, %v185_v13   ;;  %306 = vperm.xlu0 %895, %v184_v14  }
  0x33   : > { %321 = vperm.xlu1 %896, %v187_v15   ;;  %316 = vperm.xlu0 %895, %v186_v16  }
  0x37   : > { %331 = vperm.xlu1 %896, %v189_v17   ;;  %326 = vperm.xlu0 %895, %v188_v18  }
  0x3b   : > { %341 = vperm.xlu1 %896, %v191_v19   ;;  %336 = vperm.xlu0 %895, %v190_v20  }
  0x3f   : > { %351 = vperm.xlu1 %896, %v193_v21   ;;  %346 = vperm.xlu0 %895, %v192_v22  }
  0x43   : > { %361 = vperm.xlu1 %896, %v195_v23   ;;  %356 = vperm.xlu0 %895, %v194_v24  }
  0x47   : > { %371 = vperm.xlu1 %896, %v197_v25   ;;  %366 = vperm.xlu0 %895, %v196_v26  }
  0x4b   : > { %381 = vperm.xlu1 %896, %v199_v27   ;;  %376 = vperm.xlu0 %895, %v198_v28  }
  0x4f   : > { %391 = vperm.xlu1 %896, %v201_v29   ;;  %386 = vperm.xlu0 %895, %v200_v30  }
  0x53   : > { %401 = vperm.xlu1 %896, %v203_v31   ;;  %396 = vperm.xlu0 %895, %v202_v32  }
  0x57   : > { %411 = vperm.xlu1 %896, %v205_v33   ;;  %406 = vperm.xlu0 %895, %v204_v34  }
  0x5b   : > { %421 = vperm.xlu1 %896, %v207_v35   ;;  %416 = vperm.xlu0 %895, %v206_v36  }
  0x5f   : > { %431 = vperm.xlu1 %896, %v209_v37   ;;  %426 = vperm.xlu0 %895, %v208_v38  }
  0x63   : > { %441 = vperm.xlu1 %896, %v211_v39   ;;  %436 = vperm.xlu0 %895, %v210_v40  }
  0x67   : > { %451 = vperm.xlu1 %896, %v213_v41   ;;  %446 = vperm.xlu0 %895, %v212_v42  }
  0x6b   : > { %461 = vperm.xlu1 %896, %v215_v43   ;;  %456 = vperm.xlu0 %895, %v214_v44  }
  0x6f   : > { %471 = vperm.xlu1 %896, %v217_v45   ;;  %466 = vperm.xlu0 %895, %v216_v46  }
  0x73   : > { %481 = vperm.xlu1 %896, %v219_v47   ;;  %476 = vperm.xlu0 %895, %v218_v48  }
  0x77   : > { %491 = vperm.xlu1 %896, %v221_v49   ;;  %486 = vperm.xlu0 %895, %v220_v50  }
  0x7b   : > { %501 = vperm.xlu1 %896, %v223_v51   ;;  %496 = vperm.xlu0 %895, %v222_v52  }
  0x7f   : > { %511 = vperm.xlu1 %896, %v225_v53   ;;  %506 = vperm.xlu0 %895, %v224_v54  }
  0x83   : > { %521 = vperm.xlu1 %896, %v227_v55   ;;  %516 = vperm.xlu0 %895, %v226_v56  }
  0x87   : > { %531 = vperm.xlu1 %896, %v229_v57   ;;  %526 = vperm.xlu0 %895, %v228_v58  }
  0x8b   : > { %541 = vperm.xlu1 %896, %v231_v59   ;;  %536 = vperm.xlu0 %895, %v230_v60  }
  0x8f   : > { %551 = vperm.xlu1 %896, %v233_v61   ;;  %546 = vperm.xlu0 %895, %v232_v62  }
  0x92   : > { %v257_v3 = vpop.permute.xlu1 %256  ;;  %v247_v4 = vpop.permute.xlu0 %246 }
  0x93   : > { %v572_v5 = vmul.f32 %v1103_v63, %v257_v3  ;;  %v570_v6 = vmul.f32 %v1103_v63, %v247_v4  ;;  %561 = vperm.xlu1 %896, %v235_v0   ;;  %556 = vperm.xlu0 %895, %v234_v1  }
  0x95   : > { %v636_v7 = vadd.f32 %v1112_v2, %v572_v5  ;;  %v634_v8 = vadd.f32 %v1112_v2, %v570_v6 }
  0x96   : > { %v262_v9 = vpop.permute.xlu1 %261  ;;  %v252_v10 = vpop.permute.xlu0 %251 }
  0x97   : > { %700 = vst [vmem:[%s1118_s8 + $0x10] sm:$0xff] %v636_v7  ;;  %698 = vst [vmem:[%s1118_s8] sm:$0xff] %v634_v8  ;;  %v573_v11 = vmul.f32 %v1103_v63, %v262_v9  ;;  %v571_v12 = vmul.f32 %v1103_v63, %v252_v10 }
  0x99   : > { %v637_v13 = vadd.f32 %v1112_v2, %v573_v11  ;;  %v635_v14 = vadd.f32 %v1112_v2, %v571_v12 }
  0x9a   : > { %v272_v15 = vpop.permute.xlu1 %271  ;;  %v267_v16 = vpop.permute.xlu0 %266 }
  0x9b   : > { %701 = vst [vmem:[%s1118_s8 + $0x18] sm:$0xff] %v637_v13  ;;  %699 = vst [vmem:[%s1118_s8 + $0x8] sm:$0xff] %v635_v14  ;;  %v575_v17 = vmul.f32 %v1103_v63, %v272_v15  ;;  %v574_v18 = vmul.f32 %v1103_v63, %v267_v16 }
  0x9d   : > { %v639_v19 = vadd.f32 %v1112_v2, %v575_v17  ;;  %v638_v20 = vadd.f32 %v1112_v2, %v574_v18 }
  0x9e   : > { %v282_v21 = vpop.permute.xlu1 %281  ;;  %v277_v22 = vpop.permute.xlu0 %276 }
  0x9f   : > { %703 = vst [vmem:[%s1118_s8 + $0x28] sm:$0xff] %v639_v19  ;;  %702 = vst [vmem:[%s1118_s8 + $0x20] sm:$0xff] %v638_v20  ;;  %v577_v23 = vmul.f32 %v1103_v63, %v282_v21  ;;  %v576_v24 = vmul.f32 %v1103_v63, %v277_v22 }
  0xa1   : > { %v641_v25 = vadd.f32 %v1112_v2, %v577_v23  ;;  %v640_v26 = vadd.f32 %v1112_v2, %v576_v24 }
  0xa2   : > { %v292_v27 = vpop.permute.xlu1 %291  ;;  %v287_v28 = vpop.permute.xlu0 %286 }
  0xa3   : > { %705 = vst [vmem:[%s1118_s8 + $0x38] sm:$0xff] %v641_v25  ;;  %704 = vst [vmem:[%s1118_s8 + $0x30] sm:$0xff] %v640_v26  ;;  %v579_v29 = vmul.f32 %v1103_v63, %v292_v27  ;;  %v578_v30 = vmul.f32 %v1103_v63, %v287_v28 }
  0xa5   : > { %v643_v31 = vadd.f32 %v1112_v2, %v579_v29  ;;  %v642_v32 = vadd.f32 %v1112_v2, %v578_v30 }
  0xa6   : > { %v302_v33 = vpop.permute.xlu1 %301  ;;  %v297_v34 = vpop.permute.xlu0 %296 }
  0xa7   : > { %707 = vst [vmem:[%s1118_s8 + $0x48] sm:$0xff] %v643_v31  ;;  %706 = vst [vmem:[%s1118_s8 + $0x40] sm:$0xff] %v642_v32  ;;  %v581_v35 = vmul.f32 %v1103_v63, %v302_v33  ;;  %v580_v36 = vmul.f32 %v1103_v63, %v297_v34 }
  0xa9   : > { %v645_v37 = vadd.f32 %v1112_v2, %v581_v35  ;;  %v644_v38 = vadd.f32 %v1112_v2, %v580_v36 }
  0xaa   : > { %v312_v39 = vpop.permute.xlu1 %311  ;;  %v307_v40 = vpop.permute.xlu0 %306 }
  0xab   : > { %709 = vst [vmem:[%s1118_s8 + $0x58] sm:$0xff] %v645_v37  ;;  %708 = vst [vmem:[%s1118_s8 + $0x50] sm:$0xff] %v644_v38  ;;  %v583_v41 = vmul.f32 %v1103_v63, %v312_v39  ;;  %v582_v42 = vmul.f32 %v1103_v63, %v307_v40 }
  0xad   : > { %v647_v43 = vadd.f32 %v1112_v2, %v583_v41  ;;  %v646_v44 = vadd.f32 %v1112_v2, %v582_v42 }
  0xae   : > { %v322_v45 = vpop.permute.xlu1 %321  ;;  %v317_v46 = vpop.permute.xlu0 %316 }
  0xaf   : > { %711 = vst [vmem:[%s1118_s8 + $0x68] sm:$0xff] %v647_v43  ;;  %710 = vst [vmem:[%s1118_s8 + $0x60] sm:$0xff] %v646_v44  ;;  %v585_v47 = vmul.f32 %v1103_v63, %v322_v45  ;;  %v584_v48 = vmul.f32 %v1103_v63, %v317_v46 }
  0xb1   : > { %v649_v49 = vadd.f32 %v1112_v2, %v585_v47  ;;  %v648_v50 = vadd.f32 %v1112_v2, %v584_v48 }
  0xb2   : > { %v332_v51 = vpop.permute.xlu1 %331  ;;  %v327_v52 = vpop.permute.xlu0 %326 }
  0xb3   : > { %713 = vst [vmem:[%s1118_s8 + $0x78] sm:$0xff] %v649_v49  ;;  %712 = vst [vmem:[%s1118_s8 + $0x70] sm:$0xff] %v648_v50  ;;  %v587_v53 = vmul.f32 %v1103_v63, %v332_v51  ;;  %v586_v54 = vmul.f32 %v1103_v63, %v327_v52 }
  0xb5   : > { %v651_v55 = vadd.f32 %v1112_v2, %v587_v53  ;;  %v650_v56 = vadd.f32 %v1112_v2, %v586_v54 }
  0xb6   : > { %v342_v57 = vpop.permute.xlu1 %341  ;;  %v337_v58 = vpop.permute.xlu0 %336 }
  0xb7   : > { %715 = vst [vmem:[%s1118_s8 + $0x88] sm:$0xff] %v651_v55  ;;  %714 = vst [vmem:[%s1118_s8 + $0x80] sm:$0xff] %v650_v56  ;;  %v589_v59 = vmul.f32 %v1103_v63, %v342_v57  ;;  %v588_v60 = vmul.f32 %v1103_v63, %v337_v58 }
  0xb9   : > { %v653_v61 = vadd.f32 %v1112_v2, %v589_v59  ;;  %v652_v62 = vadd.f32 %v1112_v2, %v588_v60 }
  0xba   : > { %v352_v0 = vpop.permute.xlu1 %351  ;;  %v347_v1 = vpop.permute.xlu0 %346 }
  0xbb   : > { %717 = vst [vmem:[%s1118_s8 + $0x98] sm:$0xff] %v653_v61  ;;  %716 = vst [vmem:[%s1118_s8 + $0x90] sm:$0xff] %v652_v62  ;;  %v591_v3 = vmul.f32 %v1103_v63, %v352_v0  ;;  %v590_v4 = vmul.f32 %v1103_v63, %v347_v1 }
  0xbd   : > { %v655_v5 = vadd.f32 %v1112_v2, %v591_v3  ;;  %v654_v6 = vadd.f32 %v1112_v2, %v590_v4 }
  0xbe   : > { %v362_v7 = vpop.permute.xlu1 %361  ;;  %v357_v8 = vpop.permute.xlu0 %356 }
  0xbf   : > { %719 = vst [vmem:[%s1118_s8 + $0xa8] sm:$0xff] %v655_v5  ;;  %718 = vst [vmem:[%s1118_s8 + $0xa0] sm:$0xff] %v654_v6  ;;  %v593_v9 = vmul.f32 %v1103_v63, %v362_v7  ;;  %v592_v10 = vmul.f32 %v1103_v63, %v357_v8 }
  0xc1   : > { %v657_v11 = vadd.f32 %v1112_v2, %v593_v9  ;;  %v656_v12 = vadd.f32 %v1112_v2, %v592_v10 }
  0xc2   : > { %v372_v13 = vpop.permute.xlu1 %371  ;;  %v367_v14 = vpop.permute.xlu0 %366 }
  0xc3   : > { %721 = vst [vmem:[%s1118_s8 + $0xb8] sm:$0xff] %v657_v11  ;;  %720 = vst [vmem:[%s1118_s8 + $0xb0] sm:$0xff] %v656_v12  ;;  %v595_v15 = vmul.f32 %v1103_v63, %v372_v13  ;;  %v594_v16 = vmul.f32 %v1103_v63, %v367_v14 }
  0xc5   : > { %v659_v17 = vadd.f32 %v1112_v2, %v595_v15  ;;  %v658_v18 = vadd.f32 %v1112_v2, %v594_v16 }
  0xc6   : > { %v382_v19 = vpop.permute.xlu1 %381  ;;  %v377_v20 = vpop.permute.xlu0 %376 }
  0xc7   : > { %723 = vst [vmem:[%s1118_s8 + $0xc8] sm:$0xff] %v659_v17  ;;  %722 = vst [vmem:[%s1118_s8 + $0xc0] sm:$0xff] %v658_v18  ;;  %v597_v21 = vmul.f32 %v1103_v63, %v382_v19  ;;  %v596_v22 = vmul.f32 %v1103_v63, %v377_v20 }
  0xc9   : > { %v661_v23 = vadd.f32 %v1112_v2, %v597_v21  ;;  %v660_v24 = vadd.f32 %v1112_v2, %v596_v22 }
  0xca   : > { %v392_v25 = vpop.permute.xlu1 %391  ;;  %v387_v26 = vpop.permute.xlu0 %386 }
  0xcb   : > { %725 = vst [vmem:[%s1118_s8 + $0xd8] sm:$0xff] %v661_v23  ;;  %724 = vst [vmem:[%s1118_s8 + $0xd0] sm:$0xff] %v660_v24  ;;  %v599_v27 = vmul.f32 %v1103_v63, %v392_v25  ;;  %v598_v28 = vmul.f32 %v1103_v63, %v387_v26 }
  0xcd   : > { %v663_v29 = vadd.f32 %v1112_v2, %v599_v27  ;;  %v662_v30 = vadd.f32 %v1112_v2, %v598_v28 }
  0xce   : > { %v402_v31 = vpop.permute.xlu1 %401  ;;  %v397_v32 = vpop.permute.xlu0 %396 }
  0xcf   : > { %727 = vst [vmem:[%s1118_s8 + $0xe8] sm:$0xff] %v663_v29  ;;  %726 = vst [vmem:[%s1118_s8 + $0xe0] sm:$0xff] %v662_v30  ;;  %v601_v33 = vmul.f32 %v1103_v63, %v402_v31  ;;  %v600_v34 = vmul.f32 %v1103_v63, %v397_v32 }
  0xd1   : > { %v665_v35 = vadd.f32 %v1112_v2, %v601_v33  ;;  %v664_v36 = vadd.f32 %v1112_v2, %v600_v34 }
  0xd2   : > { %v412_v37 = vpop.permute.xlu1 %411  ;;  %v407_v38 = vpop.permute.xlu0 %406 }
  0xd3   : > { %729 = vst [vmem:[%s1118_s8 + $0xf8] sm:$0xff] %v665_v35  ;;  %728 = vst [vmem:[%s1118_s8 + $0xf0] sm:$0xff] %v664_v36  ;;  %v603_v39 = vmul.f32 %v1103_v63, %v412_v37  ;;  %v602_v40 = vmul.f32 %v1103_v63, %v407_v38 }
  0xd5   : > { %v667_v41 = vadd.f32 %v1112_v2, %v603_v39  ;;  %v666_v42 = vadd.f32 %v1112_v2, %v602_v40 }
  0xd6   : > { %v422_v43 = vpop.permute.xlu1 %421  ;;  %v417_v44 = vpop.permute.xlu0 %416 }
  0xd7   : > { %731 = vst [vmem:[%s1118_s8 + $0x108] sm:$0xff] %v667_v41  ;;  %730 = vst [vmem:[%s1118_s8 + $0x100] sm:$0xff] %v666_v42  ;;  %v605_v45 = vmul.f32 %v1103_v63, %v422_v43  ;;  %v604_v46 = vmul.f32 %v1103_v63, %v417_v44 }
  0xd9   : > { %v669_v47 = vadd.f32 %v1112_v2, %v605_v45  ;;  %v668_v48 = vadd.f32 %v1112_v2, %v604_v46 }
  0xda   : > { %v432_v49 = vpop.permute.xlu1 %431  ;;  %v427_v50 = vpop.permute.xlu0 %426 }
  0xdb   : > { %733 = vst [vmem:[%s1118_s8 + $0x118] sm:$0xff] %v669_v47  ;;  %732 = vst [vmem:[%s1118_s8 + $0x110] sm:$0xff] %v668_v48  ;;  %v607_v51 = vmul.f32 %v1103_v63, %v432_v49  ;;  %v606_v52 = vmul.f32 %v1103_v63, %v427_v50 }
  0xdd   : > { %v671_v53 = vadd.f32 %v1112_v2, %v607_v51  ;;  %v670_v54 = vadd.f32 %v1112_v2, %v606_v52 }
  0xde   : > { %v442_v55 = vpop.permute.xlu1 %441  ;;  %v437_v56 = vpop.permute.xlu0 %436 }
  0xdf   : > { %735 = vst [vmem:[%s1118_s8 + $0x128] sm:$0xff] %v671_v53  ;;  %734 = vst [vmem:[%s1118_s8 + $0x120] sm:$0xff] %v670_v54  ;;  %v609_v57 = vmul.f32 %v1103_v63, %v442_v55  ;;  %v608_v58 = vmul.f32 %v1103_v63, %v437_v56 }
  0xe1   : > { %v673_v59 = vadd.f32 %v1112_v2, %v609_v57  ;;  %v672_v60 = vadd.f32 %v1112_v2, %v608_v58 }
  0xe2   : > { %v452_v61 = vpop.permute.xlu1 %451  ;;  %v447_v62 = vpop.permute.xlu0 %446 }
  0xe3   : > { %737 = vst [vmem:[%s1118_s8 + $0x138] sm:$0xff] %v673_v59  ;;  %736 = vst [vmem:[%s1118_s8 + $0x130] sm:$0xff] %v672_v60  ;;  %v611_v0 = vmul.f32 %v1103_v63, %v452_v61  ;;  %v610_v1 = vmul.f32 %v1103_v63, %v447_v62 }
  0xe5   : > { %v675_v3 = vadd.f32 %v1112_v2, %v611_v0  ;;  %v674_v4 = vadd.f32 %v1112_v2, %v610_v1 }
  0xe6   : > { %v462_v5 = vpop.permute.xlu1 %461  ;;  %v457_v6 = vpop.permute.xlu0 %456 }
  0xe7   : > { %739 = vst [vmem:[%s1118_s8 + $0x148] sm:$0xff] %v675_v3  ;;  %738 = vst [vmem:[%s1118_s8 + $0x140] sm:$0xff] %v674_v4  ;;  %v613_v7 = vmul.f32 %v1103_v63, %v462_v5  ;;  %v612_v8 = vmul.f32 %v1103_v63, %v457_v6 }
  0xe9   : > { %v677_v9 = vadd.f32 %v1112_v2, %v613_v7  ;;  %v676_v10 = vadd.f32 %v1112_v2, %v612_v8 }
  0xea   : > { %v472_v11 = vpop.permute.xlu1 %471  ;;  %v467_v12 = vpop.permute.xlu0 %466 }
  0xeb   : > { %741 = vst [vmem:[%s1118_s8 + $0x158] sm:$0xff] %v677_v9  ;;  %740 = vst [vmem:[%s1118_s8 + $0x150] sm:$0xff] %v676_v10  ;;  %v615_v13 = vmul.f32 %v1103_v63, %v472_v11  ;;  %v614_v14 = vmul.f32 %v1103_v63, %v467_v12 }
  0xed   : > { %v679_v15 = vadd.f32 %v1112_v2, %v615_v13  ;;  %v678_v16 = vadd.f32 %v1112_v2, %v614_v14 }
  0xee   : > { %v482_v17 = vpop.permute.xlu1 %481  ;;  %v477_v18 = vpop.permute.xlu0 %476 }
  0xef   : > { %743 = vst [vmem:[%s1118_s8 + $0x168] sm:$0xff] %v679_v15  ;;  %742 = vst [vmem:[%s1118_s8 + $0x160] sm:$0xff] %v678_v16  ;;  %v617_v19 = vmul.f32 %v1103_v63, %v482_v17  ;;  %v616_v20 = vmul.f32 %v1103_v63, %v477_v18 }
  0xf1   : > { %v681_v21 = vadd.f32 %v1112_v2, %v617_v19  ;;  %v680_v22 = vadd.f32 %v1112_v2, %v616_v20 }
  0xf2   : > { %v492_v23 = vpop.permute.xlu1 %491  ;;  %v487_v24 = vpop.permute.xlu0 %486 }
  0xf3   : > { %745 = vst [vmem:[%s1118_s8 + $0x178] sm:$0xff] %v681_v21  ;;  %744 = vst [vmem:[%s1118_s8 + $0x170] sm:$0xff] %v680_v22  ;;  %v619_v25 = vmul.f32 %v1103_v63, %v492_v23  ;;  %v618_v26 = vmul.f32 %v1103_v63, %v487_v24 }
  0xf5   : > { %v683_v27 = vadd.f32 %v1112_v2, %v619_v25  ;;  %v682_v28 = vadd.f32 %v1112_v2, %v618_v26 }
  0xf6   : > { %v502_v29 = vpop.permute.xlu1 %501  ;;  %v497_v30 = vpop.permute.xlu0 %496 }
  0xf7   : > { %747 = vst [vmem:[%s1118_s8 + $0x188] sm:$0xff] %v683_v27  ;;  %746 = vst [vmem:[%s1118_s8 + $0x180] sm:$0xff] %v682_v28  ;;  %v621_v31 = vmul.f32 %v1103_v63, %v502_v29  ;;  %v620_v32 = vmul.f32 %v1103_v63, %v497_v30 }
  0xf9   : > { %v685_v33 = vadd.f32 %v1112_v2, %v621_v31  ;;  %v684_v34 = vadd.f32 %v1112_v2, %v620_v32 }
  0xfa   : > { %v512_v35 = vpop.permute.xlu1 %511  ;;  %v507_v36 = vpop.permute.xlu0 %506 }
  0xfb   : > { %749 = vst [vmem:[%s1118_s8 + $0x198] sm:$0xff] %v685_v33  ;;  %748 = vst [vmem:[%s1118_s8 + $0x190] sm:$0xff] %v684_v34  ;;  %v623_v37 = vmul.f32 %v1103_v63, %v512_v35  ;;  %v622_v38 = vmul.f32 %v1103_v63, %v507_v36 }
  0xfd   : > { %v687_v39 = vadd.f32 %v1112_v2, %v623_v37  ;;  %v686_v40 = vadd.f32 %v1112_v2, %v622_v38 }
  0xfe   : > { %v522_v41 = vpop.permute.xlu1 %521  ;;  %v517_v42 = vpop.permute.xlu0 %516 }
  0xff   : > { %751 = vst [vmem:[%s1118_s8 + $0x1a8] sm:$0xff] %v687_v39  ;;  %750 = vst [vmem:[%s1118_s8 + $0x1a0] sm:$0xff] %v686_v40  ;;  %v625_v43 = vmul.f32 %v1103_v63, %v522_v41  ;;  %v624_v44 = vmul.f32 %v1103_v63, %v517_v42 }
 0x101   : > { %v689_v45 = vadd.f32 %v1112_v2, %v625_v43  ;;  %v688_v46 = vadd.f32 %v1112_v2, %v624_v44 }
 0x102   : > { %v532_v47 = vpop.permute.xlu1 %531  ;;  %v527_v48 = vpop.permute.xlu0 %526 }
 0x103   : > { %753 = vst [vmem:[%s1118_s8 + $0x1b8] sm:$0xff] %v689_v45  ;;  %752 = vst [vmem:[%s1118_s8 + $0x1b0] sm:$0xff] %v688_v46  ;;  %v627_v49 = vmul.f32 %v1103_v63, %v532_v47  ;;  %v626_v50 = vmul.f32 %v1103_v63, %v527_v48 }
 0x105   : > { %v691_v51 = vadd.f32 %v1112_v2, %v627_v49  ;;  %v690_v52 = vadd.f32 %v1112_v2, %v626_v50 }
 0x106   : > { %v542_v53 = vpop.permute.xlu1 %541  ;;  %v537_v54 = vpop.permute.xlu0 %536 }
 0x107   : > { %755 = vst [vmem:[%s1118_s8 + $0x1c8] sm:$0xff] %v691_v51  ;;  %754 = vst [vmem:[%s1118_s8 + $0x1c0] sm:$0xff] %v690_v52  ;;  %v629_v55 = vmul.f32 %v1103_v63, %v542_v53  ;;  %v628_v56 = vmul.f32 %v1103_v63, %v537_v54 }
 0x109   : > { %v693_v57 = vadd.f32 %v1112_v2, %v629_v55  ;;  %v692_v58 = vadd.f32 %v1112_v2, %v628_v56 }
 0x10a   : > { %v552_v59 = vpop.permute.xlu1 %551  ;;  %v547_v60 = vpop.permute.xlu0 %546 }
 0x10b   : > { %757 = vst [vmem:[%s1118_s8 + $0x1d8] sm:$0xff] %v693_v57  ;;  %756 = vst [vmem:[%s1118_s8 + $0x1d0] sm:$0xff] %v692_v58  ;;  %v631_v61 = vmul.f32 %v1103_v63, %v552_v59  ;;  %v630_v62 = vmul.f32 %v1103_v63, %v547_v60 }
 0x10d   : > { %v695_v0 = vadd.f32 %v1112_v2, %v631_v61  ;;  %v694_v1 = vadd.f32 %v1112_v2, %v630_v62 }
 0x10e   : > { %v562_v3 = vpop.permute.xlu1 %561  ;;  %v557_v4 = vpop.permute.xlu0 %556 }
 0x10f   : > { %759 = vst [vmem:[%s1118_s8 + $0x1e8] sm:$0xff] %v695_v0  ;;  %758 = vst [vmem:[%s1118_s8 + $0x1e0] sm:$0xff] %v694_v1  ;;  %v633_v5 = vmul.f32 %v1103_v63, %v562_v3  ;;  %v632_v6 = vmul.f32 %v1103_v63, %v557_v4 }
 0x111   : > { %v697_v7 = vadd.f32 %v1112_v2, %v633_v5  ;;  %v696_v8 = vadd.f32 %v1112_v2, %v632_v6 }
 0x113   : > { %761 = vst [vmem:[%s1118_s8 + $0x1f8] sm:$0xff] %v697_v7  ;;  %760 = vst [vmem:[%s1118_s8 + $0x1f0] sm:$0xff] %v696_v8 }
 0x114   : > { %910 = shalt.err (!%p907_p3)
}
 0x115   : > { %s911_s27 = scalar_lea.hbm %s1309_s19, 8192  ;;  %s915_s30 = scalar_lea.hbm %s1362_s3, 16384 }
 0x116   : > { %p912_p4 = scmp.ne.s32.totalorder %s1309_s19, %s911_s27  ;;  %p916_p9 = scmp.lt.s32.totalorder %s1309_s19, %s1362_s3 }
 0x117   : > { %p917_p10 = scmp.lt.s32.totalorder %s915_s30, %s911_s27 }
 0x118   : > { %p913_p7 = pnand %p912_p4, %p1021_p5 }
 0x119   : > { %p918_p11 = por %p917_p10, %p916_p9 }
 0x11a   : > { %p914_p8 = pneg %p913_p7 }
 0x11c   : > { %p919_p12 = pnand %p918_p11, %p914_p8 }
 0x11e   : > { %922 = shalt.err (!%p919_p12)
}
 0x11f   : > { %s961_s6 = smov 128   ;;  %s962_s7 = smov 8  }
 0x120   : > { %853 = dma.vmem_to_hbm [thread:$0]  (%p1021_p5), %s1311_s10, 8192, %s1309_s19, %s1319_s16, %s961_s6, %s961_s6, %s962_s7  }
 0x121 PF: > { %p859_p13 = scmp.ge.s32.totalorder %s957_s15, 2  ;;  %s791_s8 = sand.u32 1, %s945_s12  }
 0x122   : > { %s792_s9 = scalar_lea.sflag [#allocation3], %s791_s8 }
 0x123   : > { %p856_p0 = pnand %p859_p13, %p1025_p6 }
 0x125   : > { %p857_p1 = pneg %p856_p0 }
 0x127   : > { %940 = dma.done.wait (%p857_p1), %s792_s9, 8192  }
 0x128   : > { %942 = vsyncadd (%p857_p1), %s792_s9, 4294959104  ;;  %p13_p2 = scmp.ge.s32.totalorder %s1008_s18, 4   ;;  %s1365_s12 = smov %s949_s13 }
 0x129   : > { %s1366_s13 = smov %s953_s14  ;;  %s1367_s14 = smov %s1019_s21 }
 0x12a   : > { %s1368_s15 = smov %s1008_s18  ;;  %15 = sbr.rel (!%p13_p2) target bundleno = 3 (0x3), region = 67 }
 0x12f   :  { %797 = vsyncpa [#allocation3], 1 }
 0x130   :  { %799 = vsyncpa [#allocation3 + $0x1], 1 }

</bundles_post_ra>
